<compile_context>
chip_gen: v5e
topology: v5e:2x2
jax: 0.10.0
libtpu: 0.0.40
codegen_flags: <defaults>
</compile_context>

<pallas_src>
import jax
import jax.numpy as jnp
from jax.experimental import pallas as pl
from jax.experimental.pallas import tpu as pltpu


def _reduce_cols_to_lane128(v):
    """(1, T) -> (1, 128) per-lane partial sums (lane-dense output block)."""
    t = v.shape[1]
    if t >= 128 and t % 128 == 0:
        acc = v[:, 0:128]
        for i in range(1, t // 128):          # static, short; pure VPU adds
            acc = acc + v[:, i * 128:(i + 1) * 128]
        return acc
    # Ragged T (tile == full H*W, not 128-aligned): full reduce into lane 0.
    s = jnp.sum(v)
    lane = jax.lax.broadcasted_iota(jnp.int32, (1, 128), 1)
    return jnp.where(lane == 0, s, jnp.float32(0.0))


def _vq_kernel(x_ref, em2_ref, et_ref, e2_ref, q_ref, md_ref):
    # x_ref  : (1, D, T)   latent columns of one batch element (NCHW native)
    # em2_ref: (Kp, D)     bf16, holds -2 * codebook (resident across the grid)
    # et_ref : (D, Kp)     f32 transposed codebook (resident, gather operand)
    # e2_ref : (Kp, 1)     f32 |e_k|^2 (padded rows = 1e30, never win)
    # q_ref  : (1, D, T)   quantized columns (NCHW native)
    # md_ref : (1, 1, 128) per-step partial sums of |x - e_chosen|^2
    x = x_ref[0]                                    # (D, T), native dtype
    xb = x.astype(jnp.bfloat16)                     # MXU operand
    em2 = em2_ref[...]                              # (Kp, D) bf16 (= -2*e)
    e_t = et_ref[...]                               # (D, Kp) f32
    e2 = e2_ref[...]                                # (Kp, 1) f32
    kp = em2.shape[0]

    # partial[k, t] = |e_k|^2 - 2 <x_t, e_k>  (|x_t|^2 cannot change the argmin)
    # bf16 MXU, f32 accumulate.
    partial = jnp.dot(em2, xb, preferred_element_type=jnp.float32) + e2   # (Kp, T)

    # argmin over K via min + iota (robust Mosaic lowering).
    # TODO(synk): fuse to a single index-producing reduction if VPU/XLU ever
    # becomes the binding slot; currently filler under the MXU.
    minp = jnp.min(partial, axis=0, keepdims=True)                        # (1, T)
    iota = jax.lax.broadcasted_iota(jnp.int32, partial.shape, 0)
    inds = jnp.min(jnp.where(partial == minp, iota, kp), axis=0, keepdims=True)
    one_hot = (iota == inds).astype(jnp.float32)                          # (Kp, T)

    # Exact gather of the selected codebook rows: q[d, t] = e[ind_t, d].
    # Kept in f32 so quantized values are the codebook rows bit-for-bit;
    # switch both operands to bf16 only if downstream tolerates rounded codes.
    q = jnp.dot(e_t, one_hot, preferred_element_type=jnp.float32)         # (D, T)
    q_ref[0] = q.astype(q_ref.dtype)

    # Exact f32 distance to the chosen code (immune to bf16 ranking error and
    # to the |x|^2 + min cancellation of rev 2), reduced to one lane vector.
    diff = x.astype(jnp.float32) - q                                      # (D, T)
    per_col = jnp.sum(diff * diff, axis=0, keepdims=True)                 # (1, T)
    md_ref[0] = _reduce_cols_to_lane128(per_col)                          # (1, 128)


def _vmem_plan(d, k_pad):
    """Generation-aware (budget_for_tile, vmem_limit_bytes)."""
    try:
        cap = int(pltpu.get_tpu_info().vmem_capacity_bytes)
    except Exception:  # pragma: no cover - conservative fallback (v7x size)
        cap = 64 * 1024 * 1024
    # ~96 MiB scoped limit on 128-MiB parts (v5e/v6e), ~48 MiB on v7x.
    limit = min(cap * 3 // 4, 100 * 1024 * 1024)
    # Resident codebook copies (double-buffered by the default pipeline):
    # em2 bf16 (Kp,D) + e_T f32 (D,Kp) + e2 f32 (Kp,1).
    resident = 2 * (k_pad * d * 2 + k_pad * d * 4 + k_pad * 4)
    budget = max(limit // 2 - resident, 2 * 1024 * 1024)
    return budget, limit


def _choose_tile_hw(hw, d, k_pad, budget_bytes, batch):
    """Largest lane-dense (multiple-of-128) divisor of hw fitting the budget."""
    if hw % 128 != 0:
        # Whole spatial axis in one tile (block dim == full dim is always legal).
        # TODO(synk): pad + mask a remainder tile for large non-128-aligned H*W.
        return hw
    # Per-column VMEM bytes: x & q blocks double-buffered, x casts / diff / q
    # live values, ~5 (K_pad, T) f32/i32 intermediates.
    bytes_per_col = 4 * (6 * d + 5 * k_pad) + 2 * d + 512
    cap = max(128, budget_bytes // bytes_per_col)
    tile = min(hw, (cap // 128) * 128)
    while tile >= 128 and hw % tile != 0:
        tile -= 128
    if tile < 128:
        tile = 128  # never below one vreg lane width (128 always divides hw here)
    if batch == 1 and tile == hw and hw % 256 == 0:
        tile = hw // 2  # guarantee >= 2 grid steps so both v7x TCs get work
    return tile


def vector_quantize(latents_nchw, embedding, beta, *, tile_hw=None):
    """Forward pass of VectorQuantizer. Returns (quantized NCHW, vq_loss)."""
    B, D, H, W = latents_nchw.shape
    K, D2 = embedding.shape
    assert D == D2, "channel dim must equal embedding_dim"
    HW = H * W
    N = B * HW

    # Free reshape -- stay in NCHW, never transpose (or up-cast) through HBM.
    x = latents_nchw.reshape(B, D, HW)

    # Codebook prep (once per call): pad K, precompute |e|^2, pre-scale by -2
    # for the bf16 distance matmul, pre-transpose for the gather.
    emb = embedding.astype(jnp.float32)
    if K >= 128:
        K_pad = ((K + 127) // 128) * 128          # full MXU passes
    else:
        K_pad = max(8, ((K + 7) // 8) * 8)        # sublane alignment
    e2 = jnp.sum(emb * emb, axis=1, keepdims=True)
    if K_pad != K:
        pad = K_pad - K
        emb_p = jnp.concatenate([emb, jnp.zeros((pad, D), jnp.float32)], axis=0)
        e2_p = jnp.concatenate([e2, jnp.full((pad, 1), 1e30, jnp.float32)], axis=0)
    else:
        emb_p, e2_p = emb, e2
    em2_b = (jnp.float32(-2.0) * emb_p).astype(jnp.bfloat16)   # (Kp, D) bf16
    e_t = emb_p.T                                               # (D, Kp) f32

    budget, vmem_limit = _vmem_plan(D, K_pad)
    if tile_hw is None:
        tile_hw = _choose_tile_hw(HW, D, K_pad, budget, B)
    assert HW % tile_hw == 0, "H*W must be divisible by tile_hw"
    n_hw = HW // tile_hw

    q, md = pl.pallas_call(
        _vq_kernel,
        out_shape=(
            jax.ShapeDtypeStruct((B, D, HW), latents_nchw.dtype),
            jax.ShapeDtypeStruct((B, 1, n_hw * 128), jnp.float32),
        ),
        grid_spec=pltpu.PrefetchScalarGridSpec(
            num_scalar_prefetch=0,
            grid=(B, n_hw),
            in_specs=[
                pl.BlockSpec((1, D, tile_hw), lambda b, j: (b, 0, j)),
                pl.BlockSpec((K_pad, D), lambda b, j: (0, 0)),
                pl.BlockSpec((D, K_pad), lambda b, j: (0, 0)),
                pl.BlockSpec((K_pad, 1), lambda b, j: (0, 0)),
            ],
            out_specs=[
                pl.BlockSpec((1, D, tile_hw), lambda b, j: (b, 0, j)),
                pl.BlockSpec((1, 1, 128), lambda b, j: (b, 0, j)),
            ],
        ),
        compiler_params=pltpu.CompilerParams(
            dimension_semantics=("parallel", "parallel"),
            vmem_limit_bytes=int(vmem_limit),
        ),
    )(x, em2_b, e_t, e2_p)

    # F.mse_loss is a mean over all N*D elements; commitment and embedding
    # losses are numerically identical in the forward pass.
    mse = jnp.sum(md) / (N * D)
    vq_loss = mse * beta + mse
    # Straight-through estimator: latents + (q - latents).detach() == q forward.
    return q.reshape(B, D, H, W), vq_loss


if __name__ == "__main__":
    # args: num_embedding=K, embedding_dim=D, beta
    K, D, beta = 16, 8, 0.25
    B, H, W = 2, 16, 16

    key = jax.random.PRNGKey(0)
    k_lat, k_emb = jax.random.split(key)
    latents = jax.random.normal(k_lat, (B, D, H, W), dtype=jnp.float32)
    # nn.Embedding(K, D).weight.data.uniform_(-1/K, 1/K)
    embedding = jax.random.uniform(
        k_emb, (K, D), dtype=jnp.float32, minval=-1.0 / K, maxval=1.0 / K)

    q, loss = vector_quantize(latents, embedding, beta)
    q = jax.block_until_ready(q)
    loss = jax.block_until_ready(loss)
    assert q.shape == (B, D, H, W)

    # Reference checks.  The bf16 MXU ranking may choose a near-nearest code on
    # close ties (deliberate, documented tolerance); the loss, however, must be
    # the exact f32 distance to whichever code the kernel actually chose.
    flat = jnp.transpose(latents, (0, 2, 3, 1)).reshape(-1, D)
    qf = jnp.transpose(q, (0, 2, 3, 1)).reshape(-1, D)
    d_all = jnp.sum((flat[:, None, :] - embedding[None, :, :]) ** 2, axis=-1)  # (N, K)
    d_min = jnp.min(d_all, axis=1)
    d_ker = jnp.sum((flat - qf) ** 2, axis=1)
    assert bool(jnp.all(d_ker <= d_min + 5e-2)), "kernel picked a far-from-nearest code"
    loss_chosen = (1.0 + beta) * jnp.mean(d_ker) / D
    assert bool(jnp.allclose(loss, loss_chosen, rtol=1e-4, atol=1e-6)), "loss mismatch"
    loss_ref = (1.0 + beta) * jnp.mean(d_min) / D
    assert bool(jnp.allclose(loss, loss_ref, rtol=5e-3, atol=1e-5)), "loss far from nearest-code loss"

    print("KERNEL_OK")
</pallas_src>

<mosaic_0001>
module attributes {stable_mosaic.version = 11 : i64} {
  func.func @_vq_kernel(%arg0: i32, %arg1: i32, %arg2: memref<1x8x256xf32, #tpu.memory_space<vmem>>, %arg3: memref<16x8xbf16, #tpu.memory_space<vmem>>, %arg4: memref<8x16xf32, #tpu.memory_space<vmem>>, %arg5: memref<16x1xf32, #tpu.memory_space<vmem>>, %arg6: memref<1x8x256xf32, #tpu.memory_space<vmem>>, %arg7: memref<1x1x128xf32, #tpu.memory_space<vmem>>) attributes {dimension_semantics = [#tpu.dimension_semantics<parallel>, #tpu.dimension_semantics<parallel>], iteration_bounds = array<i64: 2, 1>, scalar_prefetch = 0 : i64, scratch_operands = 0 : i64, tpu.core_type = #tpu.core_type<tc>, window_params = [{transform_indices = @transform_0, window_bounds = array<i64: 1, 8, 256>}, {pipeline_mode = #tpu.pipeline_mode<synchronous>, transform_indices = @transform_1, window_bounds = array<i64: 16, 8>}, {pipeline_mode = #tpu.pipeline_mode<synchronous>, transform_indices = @transform_2, window_bounds = array<i64: 8, 16>}, {pipeline_mode = #tpu.pipeline_mode<synchronous>, transform_indices = @transform_3, window_bounds = array<i64: 16, 1>}, {transform_indices = @transform_4, window_bounds = array<i64: 1, 8, 256>}, {transform_indices = @transform_5, window_bounds = array<i64: 1, 1, 128>}]} {
    %c0 = arith.constant 0 : index
    %c0_0 = arith.constant 0 : index
    %c0_1 = arith.constant 0 : index
    %0 = vector.load %arg2[%c0, %c0_0, %c0_1] : memref<1x8x256xf32, #tpu.memory_space<vmem>>, vector<1x8x256xf32>
    %1 = vector.shape_cast %0 : vector<1x8x256xf32> to vector<8x256xf32>
    %2 = arith.truncf %1 : vector<8x256xf32> to vector<8x256xbf16>
    %c0_2 = arith.constant 0 : index
    %c0_3 = arith.constant 0 : index
    %3 = vector.load %arg3[%c0_2, %c0_3] : memref<16x8xbf16, #tpu.memory_space<vmem>>, vector<16x8xbf16>
    %c0_4 = arith.constant 0 : index
    %c0_5 = arith.constant 0 : index
    %4 = vector.load %arg4[%c0_4, %c0_5] : memref<8x16xf32, #tpu.memory_space<vmem>>, vector<8x16xf32>
    %c0_6 = arith.constant 0 : index
    %c0_7 = arith.constant 0 : index
    %5 = vector.load %arg5[%c0_6, %c0_7] : memref<16x1xf32, #tpu.memory_space<vmem>>, vector<16x1xf32>
    %cst = arith.constant dense<0.000000e+00> : vector<16x256xf32>
    %6 = tpu.matmul %3, %2, %cst {dimension_numbers = #tpu.dot_dimension_numbers<[1], [0], [0], [1], [0, 0, 1, 1], [], []>} : vector<16x8xbf16>, vector<8x256xbf16>, vector<16x256xf32> -> vector<16x256xf32>
    %7 = vector.broadcast %5 : vector<16x1xf32> to vector<16x256xf32>
    %8 = arith.addf %6, %7 : vector<16x256xf32>
    %cst_8 = arith.constant dense<0x7F800000> : vector<256xf32>
    %9 = vector.multi_reduction <minimumf>, %8, %cst_8 [0] : vector<16x256xf32> to vector<256xf32>
    %10 = vector.shape_cast %9 : vector<256xf32> to vector<1x256xf32>
    %11 = tpu.iota {dimensions = array<i32: 0>} : vector<16x256xi32>
    %12 = vector.broadcast %10 : vector<1x256xf32> to vector<16x256xf32>
    %13 = arith.cmpf oeq, %8, %12 : vector<16x256xf32>
    %c16_i32 = arith.constant 16 : i32
    %14 = vector.broadcast %c16_i32 : i32 to vector<16x256xi32>
    %15 = arith.select %13, %11, %14 : vector<16x256xi1>, vector<16x256xi32>
    %cst_9 = arith.constant dense<2147483647> : vector<256xi32>
    %16 = vector.multi_reduction <minsi>, %15, %cst_9 [0] : vector<16x256xi32> to vector<256xi32>
    %17 = vector.shape_cast %16 : vector<256xi32> to vector<1x256xi32>
    %18 = vector.broadcast %17 : vector<1x256xi32> to vector<16x256xi32>
    %19 = arith.cmpi eq, %11, %18 : vector<16x256xi32>
    %20 = arith.extui %19 : vector<16x256xi1> to vector<16x256xi32>
    %21 = arith.sitofp %20 : vector<16x256xi32> to vector<16x256xf32>
    %cst_10 = arith.constant dense<0.000000e+00> : vector<8x256xf32>
    %22 = tpu.matmul %4, %21, %cst_10 {dimension_numbers = #tpu.dot_dimension_numbers<[1], [0], [0], [1], [0, 0, 1, 1], [], []>} : vector<8x16xf32>, vector<16x256xf32>, vector<8x256xf32> -> vector<8x256xf32>
    %c0_11 = arith.constant 0 : index
    %c0_12 = arith.constant 0 : index
    %c0_13 = arith.constant 0 : index
    %23 = vector.load %arg6[%c0_11, %c0_12, %c0_13] : memref<1x8x256xf32, #tpu.memory_space<vmem>>, vector<1x8x256xf32>
    %24 = vector.shape_cast %23 : vector<1x8x256xf32> to vector<8x256xf32>
    %25 = vector.shape_cast %22 : vector<8x256xf32> to vector<1x8x256xf32>
    tpu.vector_store %arg6[%c0_11, %c0_12, %c0_13], %25 {strides = array<i32>} : memref<1x8x256xf32, #tpu.memory_space<vmem>>, vector<1x8x256xf32>,
    %26 = arith.subf %1, %22 : vector<8x256xf32>
    %27 = arith.mulf %26, %26 : vector<8x256xf32>
    %cst_14 = arith.constant dense<0.000000e+00> : vector<256xf32>
    %28 = vector.multi_reduction <add>, %27, %cst_14 [0] : vector<8x256xf32> to vector<256xf32>
    %29 = vector.shape_cast %28 : vector<256xf32> to vector<1x256xf32>
    %30 = vector.extract_strided_slice %29 {offsets = [0, 0], sizes = [1, 128], strides = [1, 1]} : vector<1x256xf32> to vector<1x128xf32>
    %31 = vector.extract_strided_slice %29 {offsets = [0, 128], sizes = [1, 128], strides = [1, 1]} : vector<1x256xf32> to vector<1x128xf32>
    %32 = arith.addf %30, %31 : vector<1x128xf32>
    %c0_15 = arith.constant 0 : index
    %c0_16 = arith.constant 0 : index
    %c0_17 = arith.constant 0 : index
    %33 = vector.load %arg7[%c0_15, %c0_16, %c0_17] : memref<1x1x128xf32, #tpu.memory_space<vmem>>, vector<1x1x128xf32>
    %34 = vector.shape_cast %33 : vector<1x1x128xf32> to vector<1x128xf32>
    %35 = vector.shape_cast %32 : vector<1x128xf32> to vector<1x1x128xf32>
    tpu.vector_store %arg7[%c0_15, %c0_16, %c0_17], %35 {strides = array<i32>} : memref<1x1x128xf32, #tpu.memory_space<vmem>>, vector<1x1x128xf32>,
    return
  }
  func.func @transform_0(%arg0: i32, %arg1: i32) -> (i32, i32, i32) {
    %c0_i32 = arith.constant 0 : i32
    %c0_i32_0 = arith.constant 0 : i32
    return %arg0, %c0_i32, %arg1 : i32, i32, i32
  }
  func.func @transform_1(%arg0: i32, %arg1: i32) -> (i32, i32) {
    %c0_i32 = arith.constant 0 : i32
    %c0_i32_0 = arith.constant 0 : i32
    %c0_i32_1 = arith.constant 0 : i32
    return %c0_i32, %c0_i32_0 : i32, i32
  }
  func.func @transform_2(%arg0: i32, %arg1: i32) -> (i32, i32) {
    %c0_i32 = arith.constant 0 : i32
    %c0_i32_0 = arith.constant 0 : i32
    %c0_i32_1 = arith.constant 0 : i32
    return %c0_i32, %c0_i32_0 : i32, i32
  }
  func.func @transform_3(%arg0: i32, %arg1: i32) -> (i32, i32) {
    %c0_i32 = arith.constant 0 : i32
    %c0_i32_0 = arith.constant 0 : i32
    %c0_i32_1 = arith.constant 0 : i32
    return %c0_i32, %c0_i32_0 : i32, i32
  }
  func.func @transform_4(%arg0: i32, %arg1: i32) -> (i32, i32, i32) {
    %c0_i32 = arith.constant 0 : i32
    %c0_i32_0 = arith.constant 0 : i32
    return %arg0, %c0_i32, %arg1 : i32, i32, i32
  }
  func.func @transform_5(%arg0: i32, %arg1: i32) -> (i32, i32, i32) {
    %c0_i32 = arith.constant 0 : i32
    %c0_i32_0 = arith.constant 0 : i32
    return %arg0, %c0_i32, %arg1 : i32, i32, i32
  }
}

</mosaic_0001>

<bundles_post_ra>
// kernel: tpu_custom_call.1
= control target key start
LH: loop header
LB: loop body
LE: loop exit
PB: predicated region body
PF: predicated region fallthrough
CT: control target
= control target key end

     0   :  { %11 = vsyncpa [#allocation3], 0  ;;  %s1056_s0 = inlined_call_operand.hbm [shape: f32[2,8,256], index: 0, kind: input, shape index: {}]   ;;  %s1057_s1 = inlined_call_operand.vmem [shape: bf16[16,8], index: 1, kind: input, shape index: {}]   ;;  %s1058_s2 = inlined_call_operand.vmem [shape: f32[8,16], index: 2, kind: input, shape index: {}]   ;;  %s1059_s3 = inlined_call_operand.vmem [shape: f32[16,1], index: 3, kind: input, shape index: {}]   ;;  %s1060_s4 = inlined_call_operand.hbm [shape: f32[2,8,256], index: 4, kind: output, shape index: {0}]   ;;  %s1061_s5 = inlined_call_operand.hbm [shape: f32[2,1,128], index: 5, kind: output, shape index: {1}]  }
   0x1   :  { %13 = vsyncpa [#allocation3 + $0x1], 0 }
   0x2   :  { %14 = vsyncpa [#allocation4], 0 }
   0x3   :  { %16 = vsyncpa [#allocation4 + $0x1], 0 }
   0x4   :  { %17 = vsyncpa [#allocation7], 0 }
   0x5   :  { %19 = vsyncpa [#allocation7 + $0x1], 0  ;;  %s894_s18 = smov 0   ;;  %s896_s19 = smov 0  }
   0x6   :  { %s898_s20 = smov 0   ;;  %s900_s21 = smov 0  }
   0x7   :  { %s902_s22 = smov 0   ;;  %s904_s23 = smov 0  }
   0x8 LB: > { %s612_s24 = sadd.s32 4294967295, %s860_s23   ;;  %s613_s25 = sadd.s32 4294967294, %s860_s23   ;;  %s860_s23 = sphi %s904_s23, %s25_s23   ;;  %s856_s22 = sphi %s902_s22, %s1070_s22   ;;  %s852_s21 = sphi %s900_s21, %s1069_s21   ;;  %s848_s20 = sphi %s898_s20, %s1068_s20   ;;  %s844_s19 = sphi %s896_s19, %s1067_s19   ;;  %s840_s18 = sphi %s894_s18, %s1066_s18  }
   0x9   : > { %s37_s26 = sadd.s32 1, %s856_s22  ;;  %s46_s27 = sadd.s32 1, %s848_s20 }
   0xa   : > { %p39_p0 = scmp.ge.s32.totalorder %s37_s26, 2  ;;  %p53_p1 = scmp.ne.s32.totalorder %s848_s20, %s844_s19 }
   0xb   : > { %p54_p2 = scmp.eq.s32.totalorder %s860_s23, 0  ;;  %p59_p3 = scmp.ne.s32.totalorder %s844_s19, %s840_s18 }
   0xc   : > { %s1072_s26 = smov (%p39_p0, %s37_s26), 0  ;;  %p60_p5 = scmp.eq.s32.totalorder %s612_s24, 0 }
   0xd   : > { %p935_p4 = por %p54_p2, %p53_p1  ;;  %s41_s29 = ssub.s32 %s856_s22, %s1072_s26 }
   0xe   : > { %p148_p6 = scmp.eq.s32.totalorder %s612_s24, 1  ;;  %p44_p7 = scmp.eq.s32.totalorder %s41_s29, 0 }
   0xf   : > { %p941_p8 = por %p60_p5, %p59_p3  ;;  %p154_p10 = scmp.eq.s32.totalorder %s613_s25, 1 }
  0x10   : > { %p945_p9 = por %p148_p6, %p53_p1  ;;  %p615_p12 = scmp.ge.s32.totalorder %s860_s23, 2 }
  0x11   : > { %s950_s7 = scalar_select %p44_p7, %s848_s20, %s46_s27  }
  0x12   : > { %p952_p11 = por %p154_p10, %p59_p3  ;;  %p663_p13 = scmp.lt.s32.totalorder %s860_s23, 2 }
  0x13   : > { %s211_s9 = sand.u32 1, %s848_s20   ;;  %s643_s11 = sshll.u32 %s856_s22, 4 }
  0x14   : > { %s616_s10 = sshll.u32 %s211_s9, 4  ;;  %s222_s14 = scalar_lea.hbm %s1056_s0, %s643_s11 }
  0x15   : > { %s215_s15 = scalar_lea.vmem [#allocation2], %s616_s10  ;;  %s224_s17 = sshll.u32 %s222_s14, 4  ;;  %s225_s17 = int_to_ptr.hbm [resolvable:$true] %s224_s17 }
  0x16   : > { %s226_s16 = sshll.u32 %s215_s15, 4  ;;  %p653_p0 = pnand %p663_p13, %p935_p4  ;;  %s227_s16 = int_to_ptr.vmem [resolvable:$true] %s226_s16 }
  0x17   : > { %p619_p1 = scmp.ge.s32.totalorder %s860_s23, 1  ;;  %p231_p2 = scmp.lt.s32.totalorder %s860_s23, 3 }
  0x18   : > { %s212_s24 = scalar_lea.sflag [#allocation3], %s211_s9 }
  0x19   : > { %655 = dma.hbm_to_vmem [thread:$0]  (!%p653_p0), %s225_s17, 256, %s227_s16, %s212_s24  }
  0x1a   : > { %p232_p3 = pnand %p619_p1, %p231_p2 }
  0x1b   : > { %s968_s25 = sand.u32 (!%p232_p3), 1, %s844_s19  }
  0x1c   : > { %235 = sbr.rel (%p232_p3) target bundleno = 364 (0x16c), region = 36  ;;  %s620_s27 = sshll.u32 (!%p232_p3), %s968_s25, 4 }
  0x1d   : > { %s238_s29 = scalar_lea.sflag (!%p232_p3), [#allocation3], %s968_s25  ;;  %s241_s10 = scalar_lea.vmem (!%p232_p3), [#allocation2], %s620_s27 }
  0x21   : > { %827 = dma.done.wait (%p941_p8), %s238_s29, 256  }
  0x22   : > { %829 = vsyncadd (%p941_p8), %s238_s29, 4294967040  ;;  %v862_v0 = vmov 0   ;;  %v978_v1 = vld [vmem:[%s241_s10] sm:$0xff]  ;;  %vm304_vm0 = vcmask 1043456   ;;  %v980_v2 = vld [vmem:[%s241_s10 + $0x8] sm:$0xff]  ;;  %vm300_vm1 = vcmask 64512   ;;  %v353_v24 = vlaneseq }
  0x23   : > { %715 = vset.pattern.permute.xlu0 %v862_v0  ;;  %v278_v3 = vpack.c.bf16 %v978_v1, %v978_v1  ;;  %v279_v4 = vpack.c.bf16 %v980_v2, %v980_v2  ;;  %v283_v5 = vld [vmem:[%s1059_s3] sm:$0xff]  ;;  %v284_v9 = vld [vmem:[%s1059_s3 + $0x8] sm:$0xff]  ;;  %v863_v55 = vmov 1.0   ;;  %s645_s16 = sshll.u32 %s852_s21, 4  ;;  %s266_s10 = scalar_lea.vmem [#allocation5], %s620_s27 }
  0x24   : > { %287 = vperm.xlu0 %715, %v283_v5   ;;  %v644_v8 = vld [vmem:[%s1057_s1] sm:$0xff]  ;;  %v354_v29 = vshrl.u32 %v353_v24, 7  ;;  %s480_s29 = scalar_lea.hbm %s1060_s4, %s645_s16  ;;  %s482_s28 = sshll.u32 %s266_s10, 4  ;;  %s483_s28 = int_to_ptr.vmem [resolvable:$true] %s482_s28 }
  0x25   : > { %v306_v6 = vsel %vm304_vm0, %v278_v3, 0  ;;  %v309_v7 = vsel %vm304_vm0, %v279_v4, 0  ;;  %v282_v56 = vld [vmem:[%s1058_s2] sm:$0xff]  ;;  %vm398_vm0 = vcmask 130048   ;;  %s484_s9 = sshll.u32 %s480_s29, 4  ;;  %s463_s30 = scalar_lea.sflag [#allocation4], %s968_s25  ;;  %s485_s9 = int_to_ptr.hbm [resolvable:$true] %s484_s9 }
  0x26   : > { %318 = vmatpush.bf16.msra.mxu0 %v306_v6  ;;  %332 = vmatpush.bf16.msra.mxu1 %v309_v7  ;;  %v355_v34 = vadd.s32 8, %v354_v29  ;;  %s760_s11 = sshra.s32 %s485_s9, 4  ;;  %s766_s14 = scalar_lea.hbm %s1060_s4, 32  ;;  %s761_s11 = int_to_ptr.hbm [resolvable:$true] %s760_s11 }
  0x27   : > { %s762_s12 = scalar_lea.hbm %s761_s11, 16  ;;  %p767_p7 = scmp.lt.s32.totalorder %s761_s11, %s1060_s4 }
  0x28   : > { %p763_p4 = scmp.ne.s32.totalorder %s761_s11, %s762_s12  ;;  %p768_p8 = scmp.lt.s32.totalorder %s766_s14, %s762_s12 }
  0x29   : > { %626 = vmatmul.msk.bf16.vlgmr.msra.gmra.mxu0 %vm300_vm1, %v644_v8  ;;  %627 = vmatmul.msk.bf16.vlgmr.msra.gmra.mxu1 %vm300_vm1, %v644_v8 }
  0x2a   : > { %p764_p5 = pnand %p763_p4, %p945_p9  ;;  %p769_p10 = por %p768_p8, %p767_p7 }
  0x2c   : > { %292 = vperm.xlu0 %715, %v284_v9   ;;  %p765_p6 = pneg %p764_p5 }
  0x2e   : > { %p770_p13 = pnand %p769_p10, %p765_p6 }
  0x96   : > { %v288_v10 = vpop.permute.xlu0 %287 }
  0x9e   : > { %v293_v13 = vpop.permute.xlu0 %292 }
  0xa6   : > { %v320_v11 = vpop.f32.mrf.mxu0  ;;  %v334_v12 = vpop.f32.mrf.mxu1 }
  0xa7   : > { %v321_v16 = vadd.f32 %v320_v11, %v288_v10  ;;  %v335_v17 = vadd.f32 %v334_v12, %v288_v10 }
  0xae   : > { %v322_v14 = vpop.f32.mrf.mxu0  ;;  %v336_v15 = vpop.f32.mrf.mxu1 }
  0xaf   : > { %v323_v18 = vadd.f32 %v322_v14, %v293_v13  ;;  %v337_v19 = vadd.f32 %v336_v15, %v293_v13 }
  0xb1   : > { %v339_v20 = vmin.f32 %v321_v16, %v323_v18  ;;  %v346_v21 = vmin.f32 %v335_v17, %v337_v19 }
  0xb3   : > { %v340_v22 = vrot.slane %v339_v20, 4  ;;  %v347_v23 = vrot.slane %v346_v21, 4 }
  0xb5   : > { %v341_v25 = vmin.f32 %v339_v20, %v340_v22  ;;  %v348_v26 = vmin.f32 %v346_v21, %v347_v23 }
  0xb7   : > { %v342_v27 = vrot.slane %v341_v25, 2  ;;  %v349_v28 = vrot.slane %v348_v26, 2 }
  0xb9   : > { %v343_v30 = vmin.f32 %v341_v25, %v342_v27  ;;  %v350_v31 = vmin.f32 %v348_v26, %v349_v28 }
  0xbb   : > { %v344_v32 = vrot.slane %v343_v30, 1  ;;  %v351_v33 = vrot.slane %v350_v31, 1 }
  0xbd   : > { %v345_v35 = vmin.f32 %v343_v30, %v344_v32  ;;  %v352_v36 = vmin.f32 %v350_v31, %v351_v33 }
  0xbf   : > { %vm356_vm2 = vcmp.eq.f32.partialorder %v321_v16, %v345_v35  ;;  %vm358_vm3 = vcmp.eq.f32.partialorder %v323_v18, %v345_v35  ;;  %vm357_vm4 = vcmp.eq.f32.partialorder %v335_v17, %v352_v36  ;;  %vm359_vm5 = vcmp.eq.f32.partialorder %v337_v19, %v352_v36 }
  0xc0   : > { %v360_v37 = vsel %vm356_vm2, %v354_v29, 16  ;;  %v362_v38 = vsel %vm358_vm3, %v355_v34, 16  ;;  %v361_v39 = vsel %vm357_vm4, %v354_v29, 16  ;;  %v363_v40 = vsel %vm359_vm5, %v355_v34, 16 }
  0xc1   : > { %vm364_vm6 = vcmp.lt.s32.totalorder %v360_v37, %v362_v38  ;;  %vm375_vm7 = vcmp.lt.s32.totalorder %v361_v39, %v363_v40 }
  0xc2   : > { %v365_v41 = vsel %vm364_vm6, %v360_v37, %v362_v38  ;;  %v376_v42 = vsel %vm375_vm7, %v361_v39, %v363_v40 }
  0xc3   : > { %v366_v43 = vrot.slane %v365_v41, 4  ;;  %v377_v44 = vrot.slane %v376_v42, 4 }
  0xc5   : > { %vm367_vm8 = vcmp.lt.s32.totalorder %v365_v41, %v366_v43  ;;  %vm378_vm9 = vcmp.lt.s32.totalorder %v376_v42, %v377_v44 }
  0xc6   : > { %v368_v45 = vsel %vm367_vm8, %v365_v41, %v366_v43  ;;  %v379_v46 = vsel %vm378_vm9, %v376_v42, %v377_v44 }
  0xc7   : > { %v369_v47 = vrot.slane %v368_v45, 2  ;;  %v380_v48 = vrot.slane %v379_v46, 2 }
  0xc9   : > { %vm370_vm10 = vcmp.lt.s32.totalorder %v368_v45, %v369_v47  ;;  %vm381_vm11 = vcmp.lt.s32.totalorder %v379_v46, %v380_v48 }
  0xca   : > { %v371_v49 = vsel %vm370_vm10, %v368_v45, %v369_v47  ;;  %v382_v50 = vsel %vm381_vm11, %v379_v46, %v380_v48 }
  0xcb   : > { %v372_v51 = vrot.slane %v371_v49, 1  ;;  %v383_v52 = vrot.slane %v382_v50, 1 }
  0xcd   : > { %vm373_vm12 = vcmp.lt.s32.totalorder %v371_v49, %v372_v51  ;;  %vm384_vm13 = vcmp.lt.s32.totalorder %v382_v50, %v383_v52 }
  0xce   : > { %v374_v53 = vsel %vm373_vm12, %v371_v49, %v372_v51  ;;  %v385_v54 = vsel %vm384_vm13, %v382_v50, %v383_v52 }
  0xcf   : > { %vm388_vm14 = vcmp.eq.s32.totalorder %v355_v34, %v374_v53  ;;  %vm389_vm15 = vcmp.eq.s32.totalorder %v355_v34, %v385_v54  ;;  %vm386_vm1 = vcmp.eq.s32.totalorder %v354_v29, %v374_v53  ;;  %vm387_vm2 = vcmp.eq.s32.totalorder %v354_v29, %v385_v54 }
  0xd0   : > { %632 = vmatpush.msk.msra.mxu2 %vm388_vm14, %v863_v55  ;;  %635 = vmatpush.msk.msra.mxu3 %vm389_vm15, %v863_v55 }
  0xd2   : > { %633 = vmatpush.msk.msra.mxu2 %vm386_vm1, %v863_v55  ;;  %636 = vmatpush.msk.msra.mxu3 %vm387_vm2, %v863_v55 }
  0xd3   : > { %634 = vmatmul.msk.f32.vlgmr.msra.gmra.mxu2 %vm398_vm0, %v282_v56  ;;  %637 = vmatmul.msk.f32.vlgmr.msra.gmra.mxu3 %vm398_vm0, %v282_v56 }
 0x156   : > { %v419_v57 = vpop.f32.mrf.mxu2  ;;  %v439_v58 = vpop.f32.mrf.mxu3 }
 0x157   : > { %442 = vst [vmem:[%s266_s10] sm:$0xff] %v419_v57  ;;  %v444_v59 = vsub.f32 %v978_v1, %v419_v57  ;;  %v445_v60 = vsub.f32 %v980_v2, %v439_v58 }
 0x158   : > { %443 = vst [vmem:[%s266_s10 + $0x8] sm:$0xff] %v439_v58 }
 0x159   : > { %v446_v61 = vmul.f32 %v444_v59, %v444_v59  ;;  %v447_v62 = vmul.f32 %v445_v60, %v445_v60 }
 0x15a   : > { %773 = shalt.err (!%p770_p13)
}
 0x15b   : > { %648 = dma.vmem_to_hbm [thread:$0]  (%p945_p9), %s483_s28, 256, %s485_s9, %s463_s30   ;;  %v448_v63 = vrot.slane %v446_v61, 4  ;;  %v454_v0 = vrot.slane %v447_v62, 4 }
 0x15c   : > { %s494_s29 = scalar_lea.hbm %s1061_s5, %s852_s21  ;;  %s272_s10 = scalar_lea.vmem [#allocation6], %s968_s25 }
 0x15d   : > { %v449_v1 = vadd.f32 %v448_v63, %v446_v61  ;;  %v455_v2 = vadd.f32 %v454_v0, %v447_v62  ;;  %s496_s11 = sshll.u32 %s272_s10, 4  ;;  %s498_s12 = sshll.u32 %s494_s29, 4  ;;  %s497_s11 = int_to_ptr.vmem [resolvable:$true] %s496_s11  ;;  %s499_s12 = int_to_ptr.hbm [resolvable:$true] %s498_s12 }
 0x15e   : > { %s468_s28 = scalar_lea.sflag [#allocation7], %s968_s25  ;;  %s788_s9 = sshra.s32 %s499_s12, 4  ;;  %s789_s9 = int_to_ptr.hbm [resolvable:$true] %s788_s9 }
 0x15f   : > { %v450_v3 = vrot.slane %v449_v1, 2  ;;  %v456_v4 = vrot.slane %v455_v2, 2  ;;  %s790_s30 = scalar_lea.hbm %s789_s9, 1  ;;  %s794_s13 = scalar_lea.hbm %s1061_s5, 2 }
 0x160   : > { %p791_p0 = scmp.ne.s32.totalorder %s789_s9, %s790_s30  ;;  %p795_p3 = scmp.lt.s32.totalorder %s789_s9, %s1061_s5 }
 0x161   : > { %v451_v5 = vadd.f32 %v450_v3, %v449_v1  ;;  %v457_v6 = vadd.f32 %v456_v4, %v455_v2  ;;  %p796_p4 = scmp.lt.s32.totalorder %s794_s13, %s790_s30 }
 0x162   : > { %p792_p1 = pnand %p791_p0, %p945_p9 }
 0x163   : > { %v452_v7 = vrot.slane %v451_v5, 1  ;;  %v458_v8 = vrot.slane %v457_v6, 1  ;;  %p797_p5 = por %p796_p4, %p795_p3 }
 0x164   : > { %p793_p2 = pneg %p792_p1 }
 0x165   : > { %v453_v9 = vadd.f32 %v452_v7, %v451_v5  ;;  %v459_v10 = vadd.f32 %v458_v8, %v457_v6 }
 0x166   : > { %p798_p6 = pnand %p797_p5, %p793_p2 }
 0x167   : > { %v460_v11 = vadd.f32 %v459_v10, %v453_v9 }
 0x169   : > { %461 = vst [vmem:[%s272_s10] sm:$0x1] %v460_v11 }
 0x16a   : > { %801 = shalt.err (!%p798_p6)
}
 0x16b   : > { %649 = dma.vmem_to_hbm [thread:$0]  (%p945_p9), %s497_s11, 16, %s499_s12, %s468_s28  }
 0x16c PF: > { %s510_s25 = sand.u32 1, %s840_s18   ;;  %p657_p7 = pnand %p615_p12, %p952_p11 }
 0x16d   : > { %s511_s16 = scalar_lea.sflag [#allocation4], %s510_s25 }
 0x16e   : > { %p658_p8 = pneg %p657_p7 }
 0x170   : > { %831 = dma.done.wait (%p658_p8), %s511_s16, 256  }
 0x171   : > { %833 = vsyncadd (%p658_p8), %s511_s16, 4294967040  ;;  %s521_s17 = scalar_lea.sflag [#allocation7], %s510_s25 }
 0x172   : > { %835 = dma.done.wait (%p658_p8), %s521_s17, 16  }
 0x173   : > { %837 = vsyncadd (%p658_p8), %s521_s17, 4294967280  ;;  %s25_s23 = sadd.s32 1, %s860_s23   ;;  %s1066_s18 = smov %s844_s19 }
 0x174   : > { %p22_p10 = scmp.ge.s32.totalorder %s25_s23, 4   ;;  %s1067_s19 = smov %s848_s20 }
 0x175   : > { %s1068_s20 = smov %s950_s7  ;;  %s1069_s21 = smov %s856_s22 }
 0x176   : > { %s1070_s22 = smov %s1072_s26  ;;  %24 = sbr.rel (!%p22_p10) target bundleno = 8 (0x8), region = 98 }
 0x17b   :  { %526 = vsyncpa [#allocation3], 1 }
 0x17c   :  { %528 = vsyncpa [#allocation3 + $0x1], 1 }
 0x17d   :  { %529 = vsyncpa [#allocation4], 1 }
 0x17e   :  { %531 = vsyncpa [#allocation4 + $0x1], 1 }
 0x17f   :  { %532 = vsyncpa [#allocation7], 1 }
 0x180   :  { %534 = vsyncpa [#allocation7 + $0x1], 1 }

</bundles_post_ra>
